<compile_context>
chip_gen: v5e
topology: v5e:2x2
jax: 0.10.0
libtpu: 0.0.40
codegen_flags: <defaults>
</compile_context>

<pallas_src>
import jax
import jax.numpy as jnp
from jax.experimental import pallas as pl
from jax.experimental.pallas import tpu as pltpu

# Mini-distilroberta sized config for this sublayer.
B, S = 2, 8            # batch, sequence
I_SIZE = 64            # config.intermediate_size
H = 32                 # config.hidden_size
EPS = 1e-5             # config.layer_norm_eps
M = B * S              # folded row count


def output_kernel(x_ref, w_ref, p_ref, o_ref):
    """Fused dense + bias + (inference) dropout + LayerNorm.

    x_ref: (M, I)  activations (batch*seq folded), model dtype (f32 or bf16)
    w_ref: (I, H)  dense weight, pre-transposed from torch's (H, I) layout
    p_ref: (3, H)  packed rows: [dense bias; LN gamma; LN beta] (f32)
    o_ref: (M, H)  output in the activation dtype
    """
    x = x_ref[...]
    w = w_ref[...]
    p = p_ref[...].astype(jnp.float32)

    # MXU matmul with f32 accumulation; bias add in f32.
    y = jnp.dot(x, w, preferred_element_type=jnp.float32) + p[0:1, :]

    # Dropout: identity (inference-only kernel).

    # One-pass LayerNorm statistics, all in f32.
    mu = jnp.mean(y, axis=-1, keepdims=True)
    ms = jnp.mean(y * y, axis=-1, keepdims=True)
    var = ms - mu * mu
    out = (y - mu) * jax.lax.rsqrt(var + EPS) * p[1:2, :] + p[2:3, :]
    o_ref[...] = out.astype(o_ref.dtype)


def _vmem_spec():
    # Full-array block, resident in VMEM, no grid / index_map.
    return pl.BlockSpec(memory_space=pltpu.MemorySpace.VMEM)


def roberta_no_residual_output(params, hidden_states, input_tensor):
    """Matches RobertaNoResidualOutput.forward.

    `input_tensor` is accepted (module signature) but unused: this variant has
    NO residual add.  Inference-only (dropout is identity).
    """
    del input_tensor
    b, s, i_size = hidden_states.shape
    h = params["weight_t"].shape[1]
    x2d = hidden_states.reshape(b * s, i_size)  # fold batch*seq -> one MXU matmul
    out = pl.pallas_call(
        output_kernel,
        out_shape=jax.ShapeDtypeStruct((b * s, h), hidden_states.dtype),
        in_specs=[_vmem_spec(), _vmem_spec(), _vmem_spec()],
        out_specs=_vmem_spec(),
    )(x2d, params["weight_t"], params["packed"])
    return out.reshape(b, s, h)


def reference(params, hidden_states):
    y = hidden_states.reshape(M, I_SIZE).astype(jnp.float32) @ params["weight_t"]
    y = y + params["packed"][0]
    mu = y.mean(-1, keepdims=True)
    var = ((y - mu) ** 2).mean(-1, keepdims=True)
    y = (y - mu) / jnp.sqrt(var + EPS) * params["packed"][1] + params["packed"][2]
    return y.reshape(B, S, H)


def init_params(key):
    k_w, k_b, k_g, k_be = jax.random.split(key, 4)
    w = (0.02 * jax.random.normal(k_w, (H, I_SIZE))).astype(jnp.float32)  # torch layout
    b = (0.02 * jax.random.normal(k_b, (H,))).astype(jnp.float32)
    g = (1.0 + 0.05 * jax.random.normal(k_g, (H,))).astype(jnp.float32)
    be = (0.05 * jax.random.normal(k_be, (H,))).astype(jnp.float32)
    return {
        "weight_t": w.T,                               # (I, H): kernel does x @ W
        "packed": jnp.stack([b, g, be], axis=0),       # (3, H): packed ONCE at init
    }


if __name__ == "__main__":
    root = jax.random.PRNGKey(0)
    k_p, k_x, k_r = jax.random.split(root, 3)
    params = init_params(k_p)

    hidden_states = jax.random.normal(k_x, (B, S, I_SIZE), dtype=jnp.float32)
    input_tensor = jax.random.normal(k_r, (B, S, H), dtype=jnp.float32)  # unused (no residual)

    # f32 path
    out = roberta_no_residual_output(params, hidden_states, input_tensor)
    jax.block_until_ready(out)
    assert out.shape == (B, S, H) and out.dtype == jnp.float32

    ref = reference(params, hidden_states)
    err = float(jnp.max(jnp.abs(out - ref)))
    assert jnp.allclose(out, ref, atol=1e-5, rtol=1e-5), f"f32 max abs err {err}"

    # bf16 I/O path (matmul operands bf16, LN math f32, output bf16).
    params_bf16 = {"weight_t": params["weight_t"].astype(jnp.bfloat16),
                   "packed": params["packed"]}
    out_bf16 = roberta_no_residual_output(
        params_bf16, hidden_states.astype(jnp.bfloat16), input_tensor)
    jax.block_until_ready(out_bf16)
    assert out_bf16.dtype == jnp.bfloat16
    err_bf16 = float(jnp.max(jnp.abs(out_bf16.astype(jnp.float32) - ref)))
    assert err_bf16 < 3e-2, f"bf16 max abs err {err_bf16}"

    print("KERNEL_OK")
</pallas_src>

<mosaic_0001>
module attributes {stable_mosaic.version = 11 : i64} {
  func.func @output_kernel(%arg0: memref<16x64xf32, #tpu.memory_space<vmem>>, %arg1: memref<64x32xf32, #tpu.memory_space<vmem>>, %arg2: memref<3x32xf32, #tpu.memory_space<vmem>>, %arg3: memref<16x32xf32, #tpu.memory_space<vmem>>) attributes {dimension_semantics = [], scalar_prefetch = 0 : i64, scratch_operands = 0 : i64, tpu.core_type = #tpu.core_type<tc>} {
    %c0 = arith.constant 0 : index
    %c0_0 = arith.constant 0 : index
    %0 = vector.load %arg0[%c0, %c0_0] : memref<16x64xf32, #tpu.memory_space<vmem>>, vector<16x64xf32>
    %c0_1 = arith.constant 0 : index
    %c0_2 = arith.constant 0 : index
    %1 = vector.load %arg1[%c0_1, %c0_2] : memref<64x32xf32, #tpu.memory_space<vmem>>, vector<64x32xf32>
    %c0_3 = arith.constant 0 : index
    %c0_4 = arith.constant 0 : index
    %2 = vector.load %arg2[%c0_3, %c0_4] : memref<3x32xf32, #tpu.memory_space<vmem>>, vector<3x32xf32>
    %cst = arith.constant dense<0.000000e+00> : vector<16x32xf32>
    %3 = tpu.matmul %0, %1, %cst {dimension_numbers = #tpu.dot_dimension_numbers<[1], [0], [0], [1], [0, 0, 1, 1], [], []>} : vector<16x64xf32>, vector<64x32xf32>, vector<16x32xf32> -> vector<16x32xf32>
    %4 = vector.extract_strided_slice %2 {offsets = [0, 0], sizes = [1, 32], strides = [1, 1]} : vector<3x32xf32> to vector<1x32xf32>
    %5 = vector.broadcast %4 : vector<1x32xf32> to vector<16x32xf32>
    %6 = arith.addf %3, %5 : vector<16x32xf32>
    %cst_5 = arith.constant dense<0.000000e+00> : vector<16xf32>
    %7 = vector.multi_reduction <add>, %6, %cst_5 [1] : vector<16x32xf32> to vector<16xf32>
    %8 = vector.shape_cast %7 : vector<16xf32> to vector<16x1xf32>
    %cst_6 = arith.constant 3.200000e+01 : f32
    %9 = vector.broadcast %cst_6 : f32 to vector<16x1xf32>
    %10 = arith.divf %8, %9 : vector<16x1xf32>
    %11 = arith.mulf %6, %6 : vector<16x32xf32>
    %cst_7 = arith.constant dense<0.000000e+00> : vector<16xf32>
    %12 = vector.multi_reduction <add>, %11, %cst_7 [1] : vector<16x32xf32> to vector<16xf32>
    %13 = vector.shape_cast %12 : vector<16xf32> to vector<16x1xf32>
    %cst_8 = arith.constant 3.200000e+01 : f32
    %14 = vector.broadcast %cst_8 : f32 to vector<16x1xf32>
    %15 = arith.divf %13, %14 : vector<16x1xf32>
    %16 = arith.mulf %10, %10 : vector<16x1xf32>
    %17 = arith.subf %15, %16 : vector<16x1xf32>
    %18 = vector.broadcast %10 : vector<16x1xf32> to vector<16x32xf32>
    %19 = arith.subf %6, %18 : vector<16x32xf32>
    %cst_9 = arith.constant 9.99999974E-6 : f32
    %20 = vector.broadcast %cst_9 : f32 to vector<16x1xf32>
    %21 = arith.addf %17, %20 : vector<16x1xf32>
    %22 = math.rsqrt %21 : vector<16x1xf32>
    %23 = vector.broadcast %22 : vector<16x1xf32> to vector<16x32xf32>
    %24 = arith.mulf %19, %23 : vector<16x32xf32>
    %25 = vector.extract_strided_slice %2 {offsets = [1, 0], sizes = [1, 32], strides = [1, 1]} : vector<3x32xf32> to vector<1x32xf32>
    %26 = vector.broadcast %25 : vector<1x32xf32> to vector<16x32xf32>
    %27 = arith.mulf %24, %26 : vector<16x32xf32>
    %28 = vector.extract_strided_slice %2 {offsets = [2, 0], sizes = [1, 32], strides = [1, 1]} : vector<3x32xf32> to vector<1x32xf32>
    %29 = vector.broadcast %28 : vector<1x32xf32> to vector<16x32xf32>
    %30 = arith.addf %27, %29 : vector<16x32xf32>
    %c0_10 = arith.constant 0 : index
    %c0_11 = arith.constant 0 : index
    %31 = vector.load %arg3[%c0_10, %c0_11] : memref<16x32xf32, #tpu.memory_space<vmem>>, vector<16x32xf32>
    tpu.vector_store %arg3[%c0_10, %c0_11], %30 {strides = array<i32>} : memref<16x32xf32, #tpu.memory_space<vmem>>, vector<16x32xf32>,
    return
  }
}

</mosaic_0001>

<bundles_post_ra>
// kernel: tpu_custom_call.1
= control target key start
LH: loop header
LB: loop body
LE: loop exit
PB: predicated region body
PF: predicated region fallthrough
CT: control target
= control target key end

     0   :  { %s262_s0 = inlined_call_operand.vmem [shape: f32[16,64], index: 0, kind: input, shape index: {}]   ;;  %s263_s1 = inlined_call_operand.vmem [shape: f32[64,32], index: 1, kind: input, shape index: {}]   ;;  %s264_s2 = inlined_call_operand.vmem [shape: f32[3,32], index: 2, kind: input, shape index: {}]   ;;  %s265_s3 = inlined_call_operand.hbm [shape: f32[16,32], index: 3, kind: output, shape index: {}]  }
   0x1   :  { %v24_v0 = vld [vmem:[%s263_s1 + $0x38] sm:$0xff]  ;;  %v23_v1 = vld [vmem:[%s263_s1 + $0x30] sm:$0xff]  ;;  %v22_v2 = vld [vmem:[%s263_s1 + $0x28] sm:$0xff] }
   0x2   :  { %42 = vmatpush.msra.mxu0 %v24_v0  ;;  %141 = vmatpush.msra.mxu1 %v24_v0 }
   0x4   :  { %43 = vmatpush.msra.mxu0 %v23_v1  ;;  %142 = vmatpush.msra.mxu1 %v23_v1 }
   0x5   :  { %8 = vsyncpa [#allocation3], 0  ;;  %v21_v3 = vld [vmem:[%s263_s1 + $0x20] sm:$0xff]  ;;  %v20_v4 = vld [vmem:[%s263_s1 + $0x18] sm:$0xff]  ;;  %vm27_vm0 = vcmask 523264   ;;  %vm57_vm1 = vcmask 261120  }
   0x6   :  { %44 = vmatpush.msra.mxu0 %v22_v2  ;;  %143 = vmatpush.msra.mxu1 %v22_v2  ;;  %v19_v5 = vld [vmem:[%s263_s1 + $0x10] sm:$0xff]  ;;  %v18_v6 = vld [vmem:[%s263_s1 + $0x8] sm:$0xff]  ;;  %v17_v7 = vld [vmem:[%s263_s1] sm:$0xff]  ;;  %v185_v22 = vmov 32.0   ;;  %s127_s8 = sshll.u32 %s265_s3, 4  ;;  %s187_s9 = smov 128   ;;  %s128_s8 = int_to_ptr.hbm [resolvable:$true] %s127_s8 }
   0x7   :  { %v15_v8 = vld [vmem:[%s262_s0] sm:$0xff]  ;;  %v16_v9 = vld [vmem:[%s262_s0 + $0x8] sm:$0xff]  ;;  %153 = vrcp.f32 %v185_v22  ;;  %s186_s0 = smov [#allocation2]   ;;  %s188_s10 = smov 8  }
   0x8   :  { %45 = vmatpush.msra.mxu0 %v21_v3  ;;  %144 = vmatpush.msra.mxu1 %v21_v3  ;;  %v242_v10 = vld [vmem:[%s264_s2] sm:$0x7]  ;;  %s125_s1 = sshll.u32 %s186_s0, 4  ;;  %s126_s1 = int_to_ptr.vmem [resolvable:$true] %s125_s1 }
   0x9   :  { %v26_v11 = vperm.slane %v242_v10, 0  ;;  %v113_v51 = vperm.slane %v242_v10, 1  ;;  %v116_v55 = vperm.slane %v242_v10, 2 }
   0xa   :  { %46 = vmatpush.msra.mxu0 %v20_v4  ;;  %145 = vmatpush.msra.mxu1 %v20_v4 }
   0xc   :  { %47 = vmatpush.msra.mxu0 %v19_v5  ;;  %146 = vmatpush.msra.mxu1 %v19_v5 }
   0xd   :  { %v154_v23 = vpop.eup %153 }
   0xe   :  { %48 = vmatpush.msra.mxu0 %v18_v6  ;;  %147 = vmatpush.msra.mxu1 %v18_v6  ;;  %v65_v24 = vmul.f32 32.0, %v154_v23  ;;  %vm69_vm2 = vweird.f32 %v154_v23 }
  0x10   :  { %49 = vmatpush.msra.mxu0 %v17_v7  ;;  %148 = vmatpush.msra.mxu1 %v17_v7  ;;  %v66_v25 = vsub.f32 1.0, %v65_v24 }
  0x11   :  { %139 = vmatmul.msk.f32.vlgmr.msra.gmra.mxu0 %vm27_vm0, %v15_v8  ;;  %140 = vmatmul.msk.f32.vlgmr.msra.gmra.mxu1 %vm27_vm0, %v16_v9 }
  0x12   :  { %v67_v26 = vmul.f32 %v154_v23, %v66_v25 }
  0x14   :  { %v68_v27 = vadd.f32 %v154_v23, %v67_v26 }
  0x16   :  { %v70_v28 = vsel %vm69_vm2, %v154_v23, %v68_v27 }
  0x8e   :  { %v51_v12 = vpop.f32.mrf.mxu0  ;;  %v54_v13 = vpop.f32.mrf.mxu1 }
  0x8f   :  { %v52_v14 = vadd.f32 %v51_v12, %v26_v11  ;;  %v246_v17 = vadd.f32 %v54_v13, %v26_v11 }
  0x91   :  { %v58_v15 = vsel %vm57_vm1, %v52_v14, 0.0  ;;  %v73_v16 = vmul.f32 %v52_v14, %v52_v14  ;;  %v74_v19 = vmul.f32 %v246_v17, %v246_v17  ;;  %v61_v20 = vsel %vm57_vm1, %v246_v17, 0.0 }
  0x92   :  { %59 = vadd.xlane.f32.xlu0 %v58_v15 }
  0x93   :  { %v75_v18 = vsel %vm57_vm1, %v73_v16, 0.0  ;;  %v78_v21 = vsel %vm57_vm1, %v74_v19, 0.0 }
  0x94   :  { %76 = vadd.xlane.f32.xlu1 %v75_v18 }
  0x9a   :  { %62 = vadd.xlane.f32.xlu0 %v61_v20 }
  0x9c   :  { %79 = vadd.xlane.f32.xlu1 %v78_v21 }
 0x105   :  { %v60_v29 = vpop.xlane.xlu0 %59 }
 0x106   :  { %v71_v30 = vmul.f32 %v70_v28, %v60_v29 }
 0x107   :  { %v77_v31 = vpop.xlane.xlu1 %76 }
 0x108   :  { %v83_v32 = vmul.f32 %v71_v30, %v71_v30  ;;  %v81_v33 = vmul.f32 %v77_v31, %v70_v28  ;;  %v87_v52 = vsub.f32 %v52_v14, %v71_v30 }
 0x10a   :  { %v85_v34 = vsub.f32 %v81_v33, %v83_v32 }
 0x10c   :  { %v89_v35 = vadd.f32 1e-05, %v85_v34 }
 0x10d   :  { %v63_v36 = vpop.xlane.xlu0 %62 }
 0x10e   :  { %155 = vrsqrt.f32 %v89_v35  ;;  %v72_v37 = vmul.f32 %v70_v28, %v63_v36  ;;  %vm97_vm4 = vweird.f32 %v89_v35 }
 0x10f   :  { %v80_v38 = vpop.xlane.xlu1 %79 }
 0x110   :  { %v84_v39 = vmul.f32 %v72_v37, %v72_v37  ;;  %v82_v40 = vmul.f32 %v80_v38, %v70_v28  ;;  %v88_v62 = vsub.f32 %v246_v17, %v72_v37 }
 0x112   :  { %v86_v41 = vsub.f32 %v82_v40, %v84_v39 }
 0x114   :  { %v156_v42 = vpop.eup %155  ;;  %v90_v43 = vadd.f32 1e-05, %v86_v41 }
 0x115   :  { %v92_v44 = vmul.f32 %v156_v42, %v89_v35  ;;  %vm98_vm3 = vweird.f32 %v156_v42 }
 0x116   :  { %157 = vrsqrt.f32 %v90_v43  ;;  %vm99_vm5 = vmor %vm97_vm4, %vm98_vm3  ;;  %vm107_vm7 = vweird.f32 %v90_v43 }
 0x117   :  { %v93_v45 = vmul.f32 %v156_v42, %v92_v44 }
 0x119   :  { %v94_v46 = vmul.f32 0.5, %v93_v45 }
 0x11b   :  { %v95_v47 = vsub.f32 1.5, %v94_v46 }
 0x11c   :  { %v158_v48 = vpop.eup %157 }
 0x11d   :  { %v96_v49 = vmul.f32 %v156_v42, %v95_v47  ;;  %v102_v50 = vmul.f32 %v158_v48, %v90_v43  ;;  %vm108_vm6 = vweird.f32 %v158_v48 }
 0x11e   :  { %vm109_vm8 = vmor %vm107_vm7, %vm108_vm6 }
 0x11f   :  { %v100_v53 = vsel %vm99_vm5, %v156_v42, %v96_v49  ;;  %v103_v54 = vmul.f32 %v158_v48, %v102_v50 }
 0x120   :  { %v111_v56 = vmul.f32 %v100_v53, %v87_v52 }
 0x121   :  { %v104_v57 = vmul.f32 0.5, %v103_v54 }
 0x122   :  { %v114_v58 = vmul.f32 %v113_v51, %v111_v56 }
 0x123   :  { %v105_v59 = vsub.f32 1.5, %v104_v57 }
 0x124   :  { %v117_v60 = vadd.f32 %v116_v55, %v114_v58 }
 0x125   :  { %v106_v61 = vmul.f32 %v158_v48, %v105_v59 }
 0x126   :  { %119 = vst.msk [vmem:[#allocation2] sm:$0xff] %vm57_vm1, %v117_v60 }
 0x127   :  { %v110_v63 = vsel %vm109_vm8, %v158_v48, %v106_v61 }
 0x128   :  { %v112_v0 = vmul.f32 %v110_v63, %v88_v62 }
 0x12a   :  { %v115_v1 = vmul.f32 %v113_v51, %v112_v0 }
 0x12c   :  { %v118_v2 = vadd.f32 %v116_v55, %v115_v1 }
 0x12e   :  { %120 = vst.msk [vmem:[#allocation2 + $0x8] sm:$0xff] %vm57_vm1, %v118_v2 }
 0x12f   :  { %133 = dma.vmem_to_hbm [thread:$0]  %s126_s1, 256, %s128_s8, [#allocation3], %s187_s9, %s187_s9, %s188_s10  }
 0x130   :  { %183 = dma.done.wait [#allocation3], 256  }
 0x131   :  { %184 = vsyncadd [#allocation3], 4294967040 }
 0x132   :  { %138 = vsyncpa [#allocation3], 1 }

</bundles_post_ra>
